<compile_context>
chip_gen: v7x
topology: tpu7x:2x2x1
jax: 0.10.0
libtpu: 0.0.40
codegen_flags: <defaults>
</compile_context>

<pallas_src>
import jax
import jax.numpy as jnp
from jax.experimental import pallas as pl
from jax.experimental.pallas import tpu as pltpu

LN_EPS = 1e-5   # nn.LayerNorm default
LANE = 128
SUBLANE = 8


def _round_up(x, m):
    return (x + m - 1) // m * m


def _layernorm(h, gamma, beta):
    # Single-pass reduction: sum and sum-of-squares together, rsqrt on the EUP.
    d = h.shape[-1]
    inv_d = 1.0 / d
    s = jnp.sum(h, axis=-1, keepdims=True)
    ss = jnp.sum(h * h, axis=-1, keepdims=True)
    mu = s * inv_d
    var = jnp.maximum(ss * inv_d - mu * mu, 0.0)
    return (h - mu) * jax.lax.rsqrt(var + LN_EPS) * gamma + beta


def mlp_policy_kernel(x_ref,
                      w1_ref, b1_ref, g1_ref, bt1_ref,
                      w2_ref, b2_ref, g2_ref, bt2_ref,
                      wo_ref, bo_ref,
                      out_ref):
    # Block 1: Linear (bf16 MXU, f32 acc) -> ReLU -> LayerNorm -> Dropout(eval: id)
    h = jnp.dot(x_ref[...], w1_ref[...], preferred_element_type=jnp.float32)
    h = jnp.maximum(h + b1_ref[...], 0.0)
    h = _layernorm(h, g1_ref[...], bt1_ref[...])

    # Block 2: Linear -> ReLU -> LayerNorm -> Dropout(eval: id)
    h = jnp.dot(h.astype(w2_ref.dtype), w2_ref[...], preferred_element_type=jnp.float32)
    h = jnp.maximum(h + b2_ref[...], 0.0)
    h = _layernorm(h, g2_ref[...], bt2_ref[...])

    # Output layer: Linear (lane-dense, padded cols are zero and sliced off outside)
    out = jnp.dot(h.astype(wo_ref.dtype), wo_ref[...], preferred_element_type=jnp.float32)
    out_ref[...] = (out + bo_ref[...]).astype(out_ref.dtype)


def base_network_policy(observations, params, *, block_rows=256, mxu_dtype=jnp.bfloat16):
    """observations: [B, obs_dim] f32. params: dict of weights (see init_params)."""
    B, obs_dim = observations.shape
    w1, w2, wo = params["w1"], params["w2"], params["wo"]
    H1, H2 = w1.shape[1], w2.shape[1]
    action_dim = wo.shape[1]
    assert H1 % LANE == 0 and H2 % LANE == 0, "hidden dims must be multiples of 128"

    # Lane-dense padding of the ragged dims (obs_dim -> Kp, action_dim -> Np).
    Kp = _round_up(obs_dim, LANE)
    Np = _round_up(action_dim, LANE)

    # Row tiling: small batches get one tight block; large batches get 256-row blocks.
    TB = min(block_rows, _round_up(B, SUBLANE))
    B_pad = _round_up(B, TB)
    grid = (B_pad // TB,)

    f32 = jnp.float32
    x_p = jnp.zeros((B_pad, Kp), mxu_dtype).at[:B, :obs_dim].set(
        observations.astype(mxu_dtype))
    w1_p = jnp.zeros((Kp, H1), mxu_dtype).at[:obs_dim, :].set(w1.astype(mxu_dtype))
    w2_p = w2.astype(mxu_dtype)
    wo_p = jnp.zeros((H2, Np), mxu_dtype).at[:, :action_dim].set(wo.astype(mxu_dtype))
    bo_p = jnp.zeros((1, Np), f32).at[:, :action_dim].set(params["bo"].astype(f32))

    weights = (
        w1_p, params["b1"].astype(f32), params["g1"].astype(f32), params["bt1"].astype(f32),
        w2_p, params["b2"].astype(f32), params["g2"].astype(f32), params["bt2"].astype(f32),
        wo_p, bo_p,
    )

    vmem = pltpu.MemorySpace.VMEM

    def const_spec(a):
        # Weights / biases / LN params: same block every grid step -> VMEM-resident.
        return pl.BlockSpec(a.shape, lambda i: (0, 0), memory_space=vmem)

    flops = 2 * B_pad * (Kp * H1 + H1 * H2 + H2 * Np)
    bytes_accessed = int(
        x_p.size * x_p.dtype.itemsize
        + sum(int(a.size) * a.dtype.itemsize for a in weights)
        + B_pad * Np * 4
    )

    out_padded = pl.pallas_call(
        mlp_policy_kernel,
        out_shape=jax.ShapeDtypeStruct((B_pad, Np), jnp.float32),
        grid=grid,
        in_specs=[pl.BlockSpec((TB, Kp), lambda i: (i, 0), memory_space=vmem)]
                 + [const_spec(a) for a in weights],
        out_specs=pl.BlockSpec((TB, Np), lambda i: (i, 0), memory_space=vmem),
        compiler_params=pltpu.CompilerParams(dimension_semantics=("parallel",)),
        cost_estimate=pl.CostEstimate(flops=flops,
                                      transcendentals=2 * B_pad,
                                      bytes_accessed=bytes_accessed),
    )(x_p, *weights)

    return out_padded[:B, :action_dim]


def init_params(key, observation_dim, action_dim, hidden_dims=(128, 128)):
    """Deterministic synthetic init; weights stored as (in_dim, out_dim)."""
    ks = jax.random.split(key, 6)
    h1, h2 = hidden_dims
    params = {}
    params["w1"] = jax.random.normal(ks[0], (observation_dim, h1), jnp.float32) / jnp.sqrt(observation_dim)
    params["b1"] = jax.random.normal(ks[1], (1, h1), jnp.float32) * 0.01
    params["g1"] = jnp.ones((1, h1), jnp.float32)
    params["bt1"] = jnp.zeros((1, h1), jnp.float32)
    params["w2"] = jax.random.normal(ks[2], (h1, h2), jnp.float32) / jnp.sqrt(h1)
    params["b2"] = jax.random.normal(ks[3], (1, h2), jnp.float32) * 0.01
    params["g2"] = jnp.ones((1, h2), jnp.float32)
    params["bt2"] = jnp.zeros((1, h2), jnp.float32)
    params["wo"] = jax.random.normal(ks[4], (h2, action_dim), jnp.float32) / jnp.sqrt(h2)
    params["bo"] = jax.random.normal(ks[5], (1, action_dim), jnp.float32) * 0.01
    return params


def reference_forward(observations, params, mxu_dtype=jnp.bfloat16):
    """Pure-JAX reference of the PyTorch eval-mode forward, mirroring the kernel's
    bf16-operand / f32-accumulate matmul numerics and single-pass LayerNorm."""
    def ln(h, g, b):
        d = h.shape[-1]
        s = jnp.sum(h, -1, keepdims=True)
        ss = jnp.sum(h * h, -1, keepdims=True)
        mu = s / d
        var = jnp.maximum(ss / d - mu * mu, 0.0)
        return (h - mu) * jax.lax.rsqrt(var + LN_EPS) * g + b

    h = jnp.dot(observations.astype(mxu_dtype), params["w1"].astype(mxu_dtype),
                preferred_element_type=jnp.float32)
    h = jnp.maximum(h + params["b1"], 0.0)
    h = ln(h, params["g1"], params["bt1"])
    h = jnp.dot(h.astype(mxu_dtype), params["w2"].astype(mxu_dtype),
                preferred_element_type=jnp.float32)
    h = jnp.maximum(h + params["b2"], 0.0)
    h = ln(h, params["g2"], params["bt2"])
    return jnp.dot(h.astype(mxu_dtype), params["wo"].astype(mxu_dtype),
                   preferred_element_type=jnp.float32) + params["bo"]


if __name__ == "__main__":
    key = jax.random.PRNGKey(0)
    kx, kp = jax.random.split(key)

    batch = 8
    observation_dim = 32
    action_dim = 8
    hidden_dims = (128, 128)

    observations = jax.random.normal(kx, (batch, observation_dim), jnp.float32)
    params = init_params(kp, observation_dim, action_dim, hidden_dims)

    out = base_network_policy(observations, params)
    out = jax.block_until_ready(out)

    ref = reference_forward(observations, params)
    assert out.shape == (batch, action_dim)
    assert jnp.allclose(out, ref, atol=2e-3, rtol=2e-3), "mismatch vs reference"

    print("KERNEL_OK")
</pallas_src>

<mosaic_0001>
module attributes {stable_mosaic.version = 11 : i64} {
  func.func @mlp_policy_kernel(%arg0: i32, %arg1: memref<8x128xbf16, #tpu.memory_space<vmem>>, %arg2: memref<128x128xbf16, #tpu.memory_space<vmem>>, %arg3: memref<1x128xf32, #tpu.memory_space<vmem>>, %arg4: memref<1x128xf32, #tpu.memory_space<vmem>>, %arg5: memref<1x128xf32, #tpu.memory_space<vmem>>, %arg6: memref<128x128xbf16, #tpu.memory_space<vmem>>, %arg7: memref<1x128xf32, #tpu.memory_space<vmem>>, %arg8: memref<1x128xf32, #tpu.memory_space<vmem>>, %arg9: memref<1x128xf32, #tpu.memory_space<vmem>>, %arg10: memref<128x128xbf16, #tpu.memory_space<vmem>>, %arg11: memref<1x128xf32, #tpu.memory_space<vmem>>, %arg12: memref<8x128xf32, #tpu.memory_space<vmem>>) attributes {dimension_semantics = [#tpu.dimension_semantics<parallel>], iteration_bounds = array<i64: 1>, scalar_prefetch = 0 : i64, scratch_operands = 0 : i64, tpu.core_type = #tpu.core_type<tc>, window_params = [{transform_indices = @transform_0, window_bounds = array<i64: 8, 128>}, {pipeline_mode = #tpu.pipeline_mode<synchronous>, transform_indices = @transform_1, window_bounds = array<i64: 128, 128>}, {pipeline_mode = #tpu.pipeline_mode<synchronous>, transform_indices = @transform_2, window_bounds = array<i64: 1, 128>}, {pipeline_mode = #tpu.pipeline_mode<synchronous>, transform_indices = @transform_3, window_bounds = array<i64: 1, 128>}, {pipeline_mode = #tpu.pipeline_mode<synchronous>, transform_indices = @transform_4, window_bounds = array<i64: 1, 128>}, {pipeline_mode = #tpu.pipeline_mode<synchronous>, transform_indices = @transform_5, window_bounds = array<i64: 128, 128>}, {pipeline_mode = #tpu.pipeline_mode<synchronous>, transform_indices = @transform_6, window_bounds = array<i64: 1, 128>}, {pipeline_mode = #tpu.pipeline_mode<synchronous>, transform_indices = @transform_7, window_bounds = array<i64: 1, 128>}, {pipeline_mode = #tpu.pipeline_mode<synchronous>, transform_indices = @transform_8, window_bounds = array<i64: 1, 128>}, {pipeline_mode = #tpu.pipeline_mode<synchronous>, transform_indices = @transform_9, window_bounds = array<i64: 128, 128>}, {pipeline_mode = #tpu.pipeline_mode<synchronous>, transform_indices = @transform_10, window_bounds = array<i64: 1, 128>}, {transform_indices = @transform_11, window_bounds = array<i64: 8, 128>}]} {
    %c0 = arith.constant 0 : index
    %c0_0 = arith.constant 0 : index
    %0 = vector.load %arg1[%c0, %c0_0] : memref<8x128xbf16, #tpu.memory_space<vmem>>, vector<8x128xbf16>
    %c0_1 = arith.constant 0 : index
    %c0_2 = arith.constant 0 : index
    %1 = vector.load %arg2[%c0_1, %c0_2] : memref<128x128xbf16, #tpu.memory_space<vmem>>, vector<128x128xbf16>
    %cst = arith.constant dense<0.000000e+00> : vector<8x128xf32>
    %2 = tpu.matmul %0, %1, %cst {dimension_numbers = #tpu.dot_dimension_numbers<[1], [0], [0], [1], [0, 0, 1, 1], [], []>} : vector<8x128xbf16>, vector<128x128xbf16>, vector<8x128xf32> -> vector<8x128xf32>
    %c0_3 = arith.constant 0 : index
    %c0_4 = arith.constant 0 : index
    %3 = vector.load %arg3[%c0_3, %c0_4] : memref<1x128xf32, #tpu.memory_space<vmem>>, vector<1x128xf32>
    %4 = vector.broadcast %3 : vector<1x128xf32> to vector<8x128xf32>
    %5 = arith.addf %2, %4 : vector<8x128xf32>
    %cst_5 = arith.constant 0.000000e+00 : f32
    %6 = vector.broadcast %cst_5 : f32 to vector<8x128xf32>
    %7 = arith.maximumf %5, %6 : vector<8x128xf32>
    %c0_6 = arith.constant 0 : index
    %c0_7 = arith.constant 0 : index
    %8 = vector.load %arg4[%c0_6, %c0_7] : memref<1x128xf32, #tpu.memory_space<vmem>>, vector<1x128xf32>
    %c0_8 = arith.constant 0 : index
    %c0_9 = arith.constant 0 : index
    %9 = vector.load %arg5[%c0_8, %c0_9] : memref<1x128xf32, #tpu.memory_space<vmem>>, vector<1x128xf32>
    %cst_10 = arith.constant dense<0.000000e+00> : vector<8xf32>
    %10 = vector.multi_reduction <add>, %7, %cst_10 [1] : vector<8x128xf32> to vector<8xf32>
    %11 = vector.shape_cast %10 : vector<8xf32> to vector<8x1xf32>
    %12 = arith.mulf %7, %7 : vector<8x128xf32>
    %cst_11 = arith.constant dense<0.000000e+00> : vector<8xf32>
    %13 = vector.multi_reduction <add>, %12, %cst_11 [1] : vector<8x128xf32> to vector<8xf32>
    %14 = vector.shape_cast %13 : vector<8xf32> to vector<8x1xf32>
    %cst_12 = arith.constant 7.812500e-03 : f32
    %15 = vector.broadcast %cst_12 : f32 to vector<8x1xf32>
    %16 = arith.mulf %11, %15 : vector<8x1xf32>
    %cst_13 = arith.constant 7.812500e-03 : f32
    %17 = vector.broadcast %cst_13 : f32 to vector<8x1xf32>
    %18 = arith.mulf %14, %17 : vector<8x1xf32>
    %19 = arith.mulf %16, %16 : vector<8x1xf32>
    %20 = arith.subf %18, %19 : vector<8x1xf32>
    %cst_14 = arith.constant 0.000000e+00 : f32
    %21 = vector.broadcast %cst_14 : f32 to vector<8x1xf32>
    %22 = arith.maximumf %20, %21 : vector<8x1xf32>
    %23 = vector.broadcast %16 : vector<8x1xf32> to vector<8x128xf32>
    %24 = arith.subf %7, %23 : vector<8x128xf32>
    %cst_15 = arith.constant 9.99999974E-6 : f32
    %25 = vector.broadcast %cst_15 : f32 to vector<8x1xf32>
    %26 = arith.addf %22, %25 : vector<8x1xf32>
    %27 = math.rsqrt %26 : vector<8x1xf32>
    %28 = vector.broadcast %27 : vector<8x1xf32> to vector<8x128xf32>
    %29 = arith.mulf %24, %28 : vector<8x128xf32>
    %30 = vector.broadcast %8 : vector<1x128xf32> to vector<8x128xf32>
    %31 = arith.mulf %29, %30 : vector<8x128xf32>
    %32 = vector.broadcast %9 : vector<1x128xf32> to vector<8x128xf32>
    %33 = arith.addf %31, %32 : vector<8x128xf32>
    %34 = arith.truncf %33 : vector<8x128xf32> to vector<8x128xbf16>
    %c0_16 = arith.constant 0 : index
    %c0_17 = arith.constant 0 : index
    %35 = vector.load %arg6[%c0_16, %c0_17] : memref<128x128xbf16, #tpu.memory_space<vmem>>, vector<128x128xbf16>
    %cst_18 = arith.constant dense<0.000000e+00> : vector<8x128xf32>
    %36 = tpu.matmul %34, %35, %cst_18 {dimension_numbers = #tpu.dot_dimension_numbers<[1], [0], [0], [1], [0, 0, 1, 1], [], []>} : vector<8x128xbf16>, vector<128x128xbf16>, vector<8x128xf32> -> vector<8x128xf32>
    %c0_19 = arith.constant 0 : index
    %c0_20 = arith.constant 0 : index
    %37 = vector.load %arg7[%c0_19, %c0_20] : memref<1x128xf32, #tpu.memory_space<vmem>>, vector<1x128xf32>
    %38 = vector.broadcast %37 : vector<1x128xf32> to vector<8x128xf32>
    %39 = arith.addf %36, %38 : vector<8x128xf32>
    %cst_21 = arith.constant 0.000000e+00 : f32
    %40 = vector.broadcast %cst_21 : f32 to vector<8x128xf32>
    %41 = arith.maximumf %39, %40 : vector<8x128xf32>
    %c0_22 = arith.constant 0 : index
    %c0_23 = arith.constant 0 : index
    %42 = vector.load %arg8[%c0_22, %c0_23] : memref<1x128xf32, #tpu.memory_space<vmem>>, vector<1x128xf32>
    %c0_24 = arith.constant 0 : index
    %c0_25 = arith.constant 0 : index
    %43 = vector.load %arg9[%c0_24, %c0_25] : memref<1x128xf32, #tpu.memory_space<vmem>>, vector<1x128xf32>
    %cst_26 = arith.constant dense<0.000000e+00> : vector<8xf32>
    %44 = vector.multi_reduction <add>, %41, %cst_26 [1] : vector<8x128xf32> to vector<8xf32>
    %45 = vector.shape_cast %44 : vector<8xf32> to vector<8x1xf32>
    %46 = arith.mulf %41, %41 : vector<8x128xf32>
    %cst_27 = arith.constant dense<0.000000e+00> : vector<8xf32>
    %47 = vector.multi_reduction <add>, %46, %cst_27 [1] : vector<8x128xf32> to vector<8xf32>
    %48 = vector.shape_cast %47 : vector<8xf32> to vector<8x1xf32>
    %cst_28 = arith.constant 7.812500e-03 : f32
    %49 = vector.broadcast %cst_28 : f32 to vector<8x1xf32>
    %50 = arith.mulf %45, %49 : vector<8x1xf32>
    %cst_29 = arith.constant 7.812500e-03 : f32
    %51 = vector.broadcast %cst_29 : f32 to vector<8x1xf32>
    %52 = arith.mulf %48, %51 : vector<8x1xf32>
    %53 = arith.mulf %50, %50 : vector<8x1xf32>
    %54 = arith.subf %52, %53 : vector<8x1xf32>
    %cst_30 = arith.constant 0.000000e+00 : f32
    %55 = vector.broadcast %cst_30 : f32 to vector<8x1xf32>
    %56 = arith.maximumf %54, %55 : vector<8x1xf32>
    %57 = vector.broadcast %50 : vector<8x1xf32> to vector<8x128xf32>
    %58 = arith.subf %41, %57 : vector<8x128xf32>
    %cst_31 = arith.constant 9.99999974E-6 : f32
    %59 = vector.broadcast %cst_31 : f32 to vector<8x1xf32>
    %60 = arith.addf %56, %59 : vector<8x1xf32>
    %61 = math.rsqrt %60 : vector<8x1xf32>
    %62 = vector.broadcast %61 : vector<8x1xf32> to vector<8x128xf32>
    %63 = arith.mulf %58, %62 : vector<8x128xf32>
    %64 = vector.broadcast %42 : vector<1x128xf32> to vector<8x128xf32>
    %65 = arith.mulf %63, %64 : vector<8x128xf32>
    %66 = vector.broadcast %43 : vector<1x128xf32> to vector<8x128xf32>
    %67 = arith.addf %65, %66 : vector<8x128xf32>
    %68 = arith.truncf %67 : vector<8x128xf32> to vector<8x128xbf16>
    %c0_32 = arith.constant 0 : index
    %c0_33 = arith.constant 0 : index
    %69 = vector.load %arg10[%c0_32, %c0_33] : memref<128x128xbf16, #tpu.memory_space<vmem>>, vector<128x128xbf16>
    %cst_34 = arith.constant dense<0.000000e+00> : vector<8x128xf32>
    %70 = tpu.matmul %68, %69, %cst_34 {dimension_numbers = #tpu.dot_dimension_numbers<[1], [0], [0], [1], [0, 0, 1, 1], [], []>} : vector<8x128xbf16>, vector<128x128xbf16>, vector<8x128xf32> -> vector<8x128xf32>
    %c0_35 = arith.constant 0 : index
    %c0_36 = arith.constant 0 : index
    %71 = vector.load %arg11[%c0_35, %c0_36] : memref<1x128xf32, #tpu.memory_space<vmem>>, vector<1x128xf32>
    %72 = vector.broadcast %71 : vector<1x128xf32> to vector<8x128xf32>
    %73 = arith.addf %70, %72 : vector<8x128xf32>
    %c0_37 = arith.constant 0 : index
    %c0_38 = arith.constant 0 : index
    %74 = vector.load %arg12[%c0_37, %c0_38] : memref<8x128xf32, #tpu.memory_space<vmem>>, vector<8x128xf32>
    tpu.vector_store %arg12[%c0_37, %c0_38], %73 {strides = array<i32>} : memref<8x128xf32, #tpu.memory_space<vmem>>, vector<8x128xf32>,
    return
  }
  func.func @transform_0(%arg0: i32) -> (i32, i32) {
    %c0_i32 = arith.constant 0 : i32
    %c0_i32_0 = arith.constant 0 : i32
    return %arg0, %c0_i32 : i32, i32
  }
  func.func @transform_1(%arg0: i32) -> (i32, i32) {
    %c0_i32 = arith.constant 0 : i32
    %c0_i32_0 = arith.constant 0 : i32
    %c0_i32_1 = arith.constant 0 : i32
    return %c0_i32, %c0_i32_0 : i32, i32
  }
  func.func @transform_2(%arg0: i32) -> (i32, i32) {
    %c0_i32 = arith.constant 0 : i32
    %c0_i32_0 = arith.constant 0 : i32
    %c0_i32_1 = arith.constant 0 : i32
    return %c0_i32, %c0_i32_0 : i32, i32
  }
  func.func @transform_3(%arg0: i32) -> (i32, i32) {
    %c0_i32 = arith.constant 0 : i32
    %c0_i32_0 = arith.constant 0 : i32
    %c0_i32_1 = arith.constant 0 : i32
    return %c0_i32, %c0_i32_0 : i32, i32
  }
  func.func @transform_4(%arg0: i32) -> (i32, i32) {
    %c0_i32 = arith.constant 0 : i32
    %c0_i32_0 = arith.constant 0 : i32
    %c0_i32_1 = arith.constant 0 : i32
    return %c0_i32, %c0_i32_0 : i32, i32
  }
  func.func @transform_5(%arg0: i32) -> (i32, i32) {
    %c0_i32 = arith.constant 0 : i32
    %c0_i32_0 = arith.constant 0 : i32
    %c0_i32_1 = arith.constant 0 : i32
    return %c0_i32, %c0_i32_0 : i32, i32
  }
  func.func @transform_6(%arg0: i32) -> (i32, i32) {
    %c0_i32 = arith.constant 0 : i32
    %c0_i32_0 = arith.constant 0 : i32
    %c0_i32_1 = arith.constant 0 : i32
    return %c0_i32, %c0_i32_0 : i32, i32
  }
  func.func @transform_7(%arg0: i32) -> (i32, i32) {
    %c0_i32 = arith.constant 0 : i32
    %c0_i32_0 = arith.constant 0 : i32
    %c0_i32_1 = arith.constant 0 : i32
    return %c0_i32, %c0_i32_0 : i32, i32
  }
  func.func @transform_8(%arg0: i32) -> (i32, i32) {
    %c0_i32 = arith.constant 0 : i32
    %c0_i32_0 = arith.constant 0 : i32
    %c0_i32_1 = arith.constant 0 : i32
    return %c0_i32, %c0_i32_0 : i32, i32
  }
  func.func @transform_9(%arg0: i32) -> (i32, i32) {
    %c0_i32 = arith.constant 0 : i32
    %c0_i32_0 = arith.constant 0 : i32
    %c0_i32_1 = arith.constant 0 : i32
    return %c0_i32, %c0_i32_0 : i32, i32
  }
  func.func @transform_10(%arg0: i32) -> (i32, i32) {
    %c0_i32 = arith.constant 0 : i32
    %c0_i32_0 = arith.constant 0 : i32
    %c0_i32_1 = arith.constant 0 : i32
    return %c0_i32, %c0_i32_0 : i32, i32
  }
  func.func @transform_11(%arg0: i32) -> (i32, i32) {
    %c0_i32 = arith.constant 0 : i32
    %c0_i32_0 = arith.constant 0 : i32
    return %arg0, %c0_i32 : i32, i32
  }
}

</mosaic_0001>

<bundles_post_ra>
// kernel: tpu_custom_call.1
= control target key start
LH: loop header
LB: loop body
LE: loop exit
PB: predicated region body
PF: predicated region fallthrough
CT: control target
= control target key end

     0   :  { %16 = vsyncpa [#allocation3], 0  ;;  %s971_s0 = inlined_call_operand.hbm [shape: bf16[8,128], index: 0, kind: input, shape index: {}]   ;;  %s972_s1 = inlined_call_operand.hbm [shape: bf16[128,128], index: 1, kind: input, shape index: {}]   ;;  %s973_s2 = inlined_call_operand.vmem [shape: f32[1,128], index: 2, kind: input, shape index: {}]   ;;  %s974_s3 = inlined_call_operand.vmem [shape: f32[1,128], index: 3, kind: input, shape index: {}]   ;;  %s975_s4 = inlined_call_operand.vmem [shape: f32[1,128], index: 4, kind: input, shape index: {}]   ;;  %s976_s5 = inlined_call_operand.hbm [shape: bf16[128,128], index: 5, kind: input, shape index: {}]   ;;  %s977_s6 = inlined_call_operand.vmem [shape: f32[1,128], index: 6, kind: input, shape index: {}]   ;;  %s978_s7 = inlined_call_operand.vmem [shape: f32[1,128], index: 7, kind: input, shape index: {}]   ;;  %s979_s8 = inlined_call_operand.vmem [shape: f32[1,128], index: 8, kind: input, shape index: {}]   ;;  %s980_s9 = inlined_call_operand.hbm [shape: bf16[128,128], index: 9, kind: input, shape index: {}]   ;;  %s981_s10 = inlined_call_operand.vmem [shape: f32[1,128], index: 10, kind: input, shape index: {}]   ;;  %s982_s11 = inlined_call_operand.hbm [shape: f32[8,128], index: 11, kind: output, shape index: {}]  }
   0x1   :  { %17 = vsyncpa [#allocation6], 0 }
   0x2   :  { %18 = vsyncpa [#allocation9], 0 }
   0x3   :  { %19 = vsyncpa [#allocation4], 0  ;;  %s782_s17 = smov [#allocation5]   ;;  %s664_s21 = scalar_lea.hbm %s972_s1, 1024 }
   0x4   :  { %s35_s18 = sshll.u32 %s782_s17, 4  ;;  %p665_p0 = scmp.ne.s32.totalorder %s972_s1, %s664_s21  ;;  %s36_s18 = int_to_ptr.vmem [resolvable:$true] %s35_s18 }
   0x5   :  { %p668_p1 = scmp.lt.u32.totalorder %s664_s21, %s972_s1 }
   0x7   :  { %p670_p2 = pnand %p668_p1, %p665_p0 }
   0x9   :  { %673 = shalt.err (!%p670_p2)
}
   0xa   :  { %s674_s26 = scalar_lea.vmem %s36_s18, 1024  ;;  %p679_p4 = scmp.lt.s32.totalorder %s36_s18, %s36_s18 }
   0xb   :  { %p675_p3 = scmp.ne.s32.totalorder %s36_s18, %s674_s26  ;;  %p680_p5 = scmp.lt.s32.totalorder %s674_s26, %s674_s26 }
   0xd   :  { %p681_p6 = por %p680_p5, %p679_p4 }
   0xf   :  { %p682_p7 = pnand %p681_p6, %p675_p3 }
  0x11   :  { %685 = shalt.err (!%p682_p7)
}
  0x12   :  { %s783_s27 = smov 64   ;;  %s784_s28 = smov 4  }
  0x13   :  { %41 = dma.hbm_to_vmem [thread:$0]  %s972_s1, 1024, %s36_s18, [#allocation6], %s783_s27, %s783_s27, %s784_s28  }
  0x14   :  { %s785_s12 = smov [#allocation2]   ;;  %s786_s14 = smov [#allocation7]  }
  0x15   :  { %s26_s13 = sshll.u32 %s785_s12, 4  ;;  %s53_s15 = sshll.u32 %s786_s14, 4  ;;  %s27_s13 = int_to_ptr.vmem [resolvable:$true] %s26_s13  ;;  %s54_s15 = int_to_ptr.vmem [resolvable:$true] %s53_s15 }
  0x16   :  { %s686_s19 = scalar_lea.hbm %s971_s0, 64 }
  0x17   :  { %p687_p8 = scmp.ne.s32.totalorder %s971_s0, %s686_s19  ;;  %p690_p9 = scmp.lt.u32.totalorder %s686_s19, %s971_s0 }
  0x19   :  { %p692_p10 = pnand %p690_p9, %p687_p8 }
  0x1b   :  { %695 = shalt.err (!%p692_p10)
}
  0x1c   :  { %s696_s1 = scalar_lea.vmem %s27_s13, 64  ;;  %p701_p12 = scmp.lt.s32.totalorder %s27_s13, %s27_s13 }
  0x1d   :  { %p697_p11 = scmp.ne.s32.totalorder %s27_s13, %s696_s1  ;;  %p702_p13 = scmp.lt.s32.totalorder %s696_s1, %s696_s1 }
  0x1f   :  { %p703_p0 = por %p702_p13, %p701_p12 }
  0x21   :  { %p704_p1 = pnand %p703_p0, %p697_p11 }
  0x23   :  { %707 = shalt.err (!%p704_p1)
}
  0x24   :  { %29 = dma.hbm_to_vmem [thread:$0]  %s971_s0, 64, %s27_s13, [#allocation3]  }
  0x25   :  { %s708_s29 = scalar_lea.hbm %s976_s5, 1024 }
  0x26   :  { %p709_p2 = scmp.ne.s32.totalorder %s976_s5, %s708_s29  ;;  %p712_p3 = scmp.lt.u32.totalorder %s708_s29, %s976_s5 }
  0x28   :  { %p714_p4 = pnand %p712_p3, %p709_p2 }
  0x2a   :  { %717 = shalt.err (!%p714_p4)
}
  0x2b   :  { %s718_s17 = scalar_lea.vmem %s54_s15, 1024  ;;  %p723_p6 = scmp.lt.s32.totalorder %s54_s15, %s54_s15 }
  0x2c   :  { %p719_p5 = scmp.ne.s32.totalorder %s54_s15, %s718_s17  ;;  %p724_p7 = scmp.lt.s32.totalorder %s718_s17, %s718_s17 }
  0x2e   :  { %p725_p8 = por %p724_p7, %p723_p6 }
  0x30   :  { %p726_p9 = pnand %p725_p8, %p719_p5 }
  0x32   :  { %729 = shalt.err (!%p726_p9)
}
  0x33   :  { %59 = dma.hbm_to_vmem [thread:$0]  %s976_s5, 1024, %s54_s15, [#allocation6], %s783_s27, %s783_s27, %s784_s28  }
  0x34   :  { %s787_s19 = smov [#allocation8]   ;;  %s730_s23 = scalar_lea.hbm %s980_s9, 1024 }
  0x35   :  { %s71_s20 = sshll.u32 %s787_s19, 4  ;;  %p731_p10 = scmp.ne.s32.totalorder %s980_s9, %s730_s23  ;;  %s72_s20 = int_to_ptr.vmem [resolvable:$true] %s71_s20 }
  0x36   :  { %p734_p11 = scmp.lt.u32.totalorder %s730_s23, %s980_s9 }
  0x38   :  { %p736_p12 = pnand %p734_p11, %p731_p10 }
  0x3a   :  { %739 = shalt.err (!%p736_p12)
}
  0x3b   :  { %s740_s26 = scalar_lea.vmem %s72_s20, 1024  ;;  %p745_p0 = scmp.lt.s32.totalorder %s72_s20, %s72_s20 }
  0x3c   :  { %p741_p13 = scmp.ne.s32.totalorder %s72_s20, %s740_s26  ;;  %p746_p1 = scmp.lt.s32.totalorder %s740_s26, %s740_s26 }
  0x3e   :  { %p747_p2 = por %p746_p1, %p745_p0 }
  0x40   :  { %p748_p3 = pnand %p747_p2, %p741_p13 }
  0x42   :  { %751 = shalt.err (!%p748_p3)
}
  0x43   :  { %77 = dma.hbm_to_vmem [thread:$0]  %s980_s9, 1024, %s72_s20, [#allocation9], %s783_s27, %s783_s27, %s784_s28  }
  0x44   :  { %774 = dma.done.wait [#allocation3], 64  }
  0x45   :  { %775 = vsyncadd [#allocation3], 4294967232 }
  0x46   :  { %776 = dma.done.wait [#allocation6], 2048  }
  0x47   :  { %777 = vsyncadd [#allocation6], 4294965248 }
  0x48   :  { %778 = dma.done.wait [#allocation9], 1024  }
  0x49   :  { %779 = vsyncadd [#allocation9], 4294966272  ;;  %v788_v0 = vmov 0.0   ;;  %vm789_vm0 = vmmov 0   ;;  %v636_v1 = vld [vmem:[#allocation5] sm:$0xff]   ;;  %v637_v2 = vld [vmem:[#allocation5 + $0x8] sm:$0xff]  }
  0x4a   :  { %567 = vmatprep.subr.bf16.mxu0 %v788_v0  ;;  %583 = vmatprep.mubr.msk.bf16.mxu0 %vm789_vm0, %v788_v0  ;;  %v638_v3 = vld [vmem:[#allocation5 + $0x10] sm:$0xff]   ;;  %v639_v4 = vld [vmem:[#allocation5 + $0x18] sm:$0xff]   ;;  %v640_v5 = vld [vmem:[#allocation5 + $0x20] sm:$0xff]   ;;  %s790_s13 = smov [#allocation10]  }
  0x4b   :  { %587 = vmatprep.subr.bf16.mxu1 %v788_v0  ;;  %603 = vmatprep.mubr.msk.bf16.mxu1 %vm789_vm0, %v788_v0  ;;  %v641_v6 = vld [vmem:[#allocation5 + $0x28] sm:$0xff]   ;;  %v642_v7 = vld [vmem:[#allocation5 + $0x30] sm:$0xff]   ;;  %v643_v8 = vld [vmem:[#allocation5 + $0x38] sm:$0xff]   ;;  %s498_s19 = sshll.u32 %s790_s13, 4  ;;  %s499_s19 = int_to_ptr.vmem [resolvable:$true] %s498_s19 }
  0x4c   :  { %568 = vmatpush3.bf16.msra.mxu0 %v636_v1  ;;  %v93_v9 = vld [vmem:[#allocation2] sm:$0xf]  ;;  %v644_v18 = vld [vmem:[#allocation7] sm:$0xff]   ;;  %v645_v19 = vld [vmem:[#allocation7 + $0x8] sm:$0xff]   ;;  %p757_p5 = scmp.lt.s32.totalorder %s499_s19, %s499_s19 }
  0x4d   :  { %569 = vmatprep.subr.bf16.mxu0 %v788_v0  ;;  %v509_v10 = vld [vmem:[%s973_s2] ss:$0 sm:$0xff]  ;;  %588 = vmatpush3.bf16.msra.mxu1 %v644_v18  ;;  %v646_v20 = vld [vmem:[#allocation7 + $0x10] sm:$0xff]   ;;  %v648_v22 = vld [vmem:[#allocation7 + $0x20] sm:$0xff]  }
  0x4e   :  { %589 = vmatprep.subr.bf16.mxu1 %v788_v0  ;;  %v647_v21 = vld [vmem:[#allocation7 + $0x18] sm:$0xff]   ;;  %v649_v23 = vld [vmem:[#allocation7 + $0x28] sm:$0xff]   ;;  %v650_v24 = vld [vmem:[#allocation7 + $0x30] sm:$0xff]  }
  0x4f   :  { %v651_v25 = vld [vmem:[#allocation7 + $0x38] sm:$0xff]   ;;  %v652_v50 = vld [vmem:[#allocation8] sm:$0xff]   ;;  %v653_v51 = vld [vmem:[#allocation8 + $0x8] sm:$0xff]  }
  0x50   :  { %570 = vmatpush3.bf16.msra.mxu0 %v637_v2  ;;  %v518_v36 = vld [vmem:[%s974_s3] ss:$0 sm:$0xff]  ;;  %v654_v52 = vld [vmem:[#allocation8 + $0x10] sm:$0xff]   ;;  %v656_v54 = vld [vmem:[#allocation8 + $0x20] sm:$0xff]  }
  0x51   :  { %571 = vmatprep.subr.bf16.mxu0 %v788_v0  ;;  %590 = vmatpush3.bf16.msra.mxu1 %v645_v19  ;;  %v519_v38 = vld [vmem:[%s975_s4] ss:$0 sm:$0xff]  ;;  %v657_v55 = vld [vmem:[#allocation8 + $0x28] sm:$0xff]   ;;  %v658_v56 = vld [vmem:[#allocation8 + $0x30] sm:$0xff]  }
  0x52   :  { %591 = vmatprep.subr.bf16.mxu1 %v788_v0  ;;  %v520_v42 = vld [vmem:[%s977_s6] ss:$0 sm:$0xff] }
  0x53   :  { %v655_v53 = vld [vmem:[#allocation8 + $0x18] sm:$0xff]  }
  0x54   :  { %572 = vmatpush3.bf16.msra.mxu0 %v638_v3  ;;  %v659_v57 = vld [vmem:[#allocation8 + $0x38] sm:$0xff]  }
  0x55   :  { %573 = vmatprep.subr.bf16.mxu0 %v788_v0  ;;  %592 = vmatpush3.bf16.msra.mxu1 %v646_v20 }
  0x56   :  { %593 = vmatprep.subr.bf16.mxu1 %v788_v0 }
  0x58   :  { %574 = vmatpush3.bf16.msra.mxu0 %v639_v4 }
  0x59   :  { %575 = vmatprep.subr.bf16.mxu0 %v788_v0  ;;  %594 = vmatpush3.bf16.msra.mxu1 %v647_v21 }
  0x5a   :  { %595 = vmatprep.subr.bf16.mxu1 %v788_v0 }
  0x5c   :  { %576 = vmatpush3.bf16.msra.mxu0 %v640_v5  ;;  %v529_v5 = vld [vmem:[%s978_s7] ss:$0 sm:$0xff]  ;;  %s752_s7 = scalar_lea.vmem %s499_s19, 128 }
  0x5d   :  { %577 = vmatprep.subr.bf16.mxu0 %v788_v0  ;;  %596 = vmatpush3.bf16.msra.mxu1 %v648_v22  ;;  %p753_p4 = scmp.ne.s32.totalorder %s499_s19, %s752_s7  ;;  %p758_p6 = scmp.lt.s32.totalorder %s752_s7, %s752_s7 }
  0x5e   :  { %597 = vmatprep.subr.bf16.mxu1 %v788_v0 }
  0x5f   :  { %p759_p7 = por %p758_p6, %p757_p5 }
  0x60   :  { %578 = vmatpush3.bf16.msra.mxu0 %v641_v6 }
  0x61   :  { %579 = vmatprep.subr.bf16.mxu0 %v788_v0  ;;  %598 = vmatpush3.bf16.msra.mxu1 %v649_v23  ;;  %p760_p8 = pnand %p759_p7, %p753_p4 }
  0x62   :  { %599 = vmatprep.subr.bf16.mxu1 %v788_v0 }
  0x64   :  { %580 = vmatpush3.bf16.msra.mxu0 %v642_v7 }
  0x65   :  { %581 = vmatprep.subr.bf16.mxu0 %v788_v0  ;;  %600 = vmatpush3.bf16.msra.mxu1 %v650_v24 }
  0x66   :  { %601 = vmatprep.subr.bf16.mxu1 %v788_v0 }
  0x68   :  { %582 = vmatpush3.bf16.msra.mxu0 %v643_v8 }
  0x69   :  { %607 = vmatprep.subr.bf16.mxu0 %v788_v0  ;;  %602 = vmatpush3.bf16.msra.mxu1 %v651_v25 }
  0x6b   :  { %584 = vmatmul.mubr.bf16.vlgmr.msra.gmra.mrb[0].mxu0 %v93_v9 }
  0x6c   :  { %623 = vmatprep.mubr.msk.bf16.mxu0 %vm789_vm0, %v788_v0  ;;  %608 = vmatpush3.bf16.msra.mxu0 %v652_v50 }
  0x6d   :  { %609 = vmatprep.subr.bf16.mxu0 %v788_v0 }
  0x70   :  { %610 = vmatpush3.bf16.msra.mxu0 %v653_v51 }
  0x71   :  { %611 = vmatprep.subr.bf16.mxu0 %v788_v0 }
  0x74   :  { %612 = vmatpush3.bf16.msra.mxu0 %v654_v52 }
  0x75   :  { %613 = vmatprep.subr.bf16.mxu0 %v788_v0 }
  0x78   :  { %614 = vmatpush3.bf16.msra.mxu0 %v655_v53 }
  0x79   :  { %615 = vmatprep.subr.bf16.mxu0 %v788_v0 }
  0x7c   :  { %616 = vmatpush3.bf16.msra.mxu0 %v656_v54 }
  0x7d   :  { %617 = vmatprep.subr.bf16.mxu0 %v788_v0 }
  0x80   :  { %618 = vmatpush3.bf16.msra.mxu0 %v657_v55 }
  0x81   :  { %619 = vmatprep.subr.bf16.mxu0 %v788_v0 }
  0x84   :  { %620 = vmatpush3.bf16.msra.mxu0 %v658_v56 }
  0x85   :  { %621 = vmatprep.subr.bf16.mxu0 %v788_v0  ;;  %v530_v0 = vld [vmem:[%s979_s8] ss:$0 sm:$0xff] }
  0x88   :  { %622 = vmatpush3.bf16.msra.mxu0 %v659_v57 }
 0x13e   :  { %v199_v11 = vpop.f32.mrb[0].mxu0 }
 0x13f   :  { %v200_v12 = vadd.f32 %v509_v10, %v199_v11  ;;  %v585_v13 = vpop.f32.mrb[1].mxu0  ;;  %v531_v10 = vld [vmem:[%s981_s10] ss:$0 sm:$0xff] }
 0x140   :  { %v202_v14 = vpop.f32.mrb[2].mxu0 }
 0x141   :  { %v205_v15 = vmax.f32 %v200_v12, 0.0  ;;  %v586_v16 = vpop.f32.mrb[3].mxu0 }
 0x143   :  { %208 = vadd.xlane.f32.xlu0 %v205_v15  ;;  %v210_v17 = vmul.f32 %v205_v15, %v205_v15 }
 0x147   :  { %211 = vadd.xlane.f32.xlu0 %v210_v17 }
 0x1d0   :  { %v209_v26 = vpop.xlane.xlu0 %208 }
 0x1d1   :  { %v213_v27 = vmul.f32 0.0078125, %v209_v26 }
 0x1d3   :  { %v215_v29 = vmul.f32 %v213_v27, %v213_v27  ;;  %v218_v34 = vsub.f32 %v205_v15, %v213_v27 }
 0x1d4   :  { %v212_v28 = vpop.xlane.xlu0 %211 }
 0x1d5   :  { %v214_v30 = vmul.f32 0.0078125, %v212_v28 }
 0x1d7   :  { %v216_v31 = vsub.f32 %v214_v30, %v215_v29 }
 0x1d9   :  { %v217_v32 = vmax.f32 %v216_v31, 0.0 }
 0x1db   :  { %v219_v33 = vadd.f32 1e-05, %v217_v32 }
 0x1dd   :  { %660 = vrsqrt.f32 %v219_v33 }
 0x1e7   :  { %v661_v35 = vpop.eup %660 }
 0x1e8   :  { %v221_v37 = vmul.f32 %v661_v35, %v218_v34 }
 0x1ea   :  { %v228_v39 = vmul.f32 %v518_v36, %v221_v37 }
 0x1ec   :  { %v235_v40 = vadd.f32 %v519_v38, %v228_v39 }
 0x1ee   :  { %v236_v41 = vpack.c.bf16 %v235_v40, %v235_v40 }
 0x1f0   :  { %604 = vmatmul.mubr.bf16.vlgmr.msra.gmra.mrb[0].mxu1 %v236_v41 }
 0x2c3   :  { %v342_v43 = vpop.f32.mrb[0].mxu1 }
 0x2c4   :  { %v343_v44 = vadd.f32 %v520_v42, %v342_v43  ;;  %v605_v45 = vpop.f32.mrb[1].mxu1 }
 0x2c5   :  { %v345_v46 = vpop.f32.mrb[2].mxu1 }
 0x2c6   :  { %v348_v47 = vmax.f32 %v343_v44, 0.0  ;;  %v606_v48 = vpop.f32.mrb[3].mxu1 }
 0x2c8   :  { %351 = vadd.xlane.f32.xlu1 %v348_v47  ;;  %v353_v49 = vmul.f32 %v348_v47, %v348_v47 }
 0x2cc   :  { %354 = vadd.xlane.f32.xlu1 %v353_v49 }
 0x355   :  { %v352_v58 = vpop.xlane.xlu1 %351 }
 0x356   :  { %v356_v59 = vmul.f32 0.0078125, %v352_v58 }
 0x358   :  { %v358_v61 = vmul.f32 %v356_v59, %v356_v59  ;;  %v361_v3 = vsub.f32 %v348_v47, %v356_v59 }
 0x359   :  { %v355_v60 = vpop.xlane.xlu1 %354 }
 0x35a   :  { %v357_v62 = vmul.f32 0.0078125, %v355_v60 }
 0x35c   :  { %v359_v63 = vsub.f32 %v357_v62, %v358_v61 }
 0x35e   :  { %v360_v1 = vmax.f32 %v359_v63, 0.0 }
 0x360   :  { %v362_v2 = vadd.f32 1e-05, %v360_v1 }
 0x362   :  { %662 = vrsqrt.f32 %v362_v2 }
 0x36c   :  { %v663_v4 = vpop.eup %662 }
 0x36d   :  { %v364_v6 = vmul.f32 %v663_v4, %v361_v3 }
 0x36f   :  { %v371_v7 = vmul.f32 %v529_v5, %v364_v6 }
 0x371   :  { %v378_v8 = vadd.f32 %v530_v0, %v371_v7 }
 0x373   :  { %v379_v9 = vpack.c.bf16 %v378_v8, %v378_v8 }
 0x375   :  { %624 = vmatmul.mubr.bf16.vlgmr.msra.gmra.mrb[4].mxu0 %v379_v9 }
 0x448   :  { %v485_v11 = vpop.f32.mrb[4].mxu0 }
 0x449   :  { %v486_v12 = vadd.f32 %v531_v10, %v485_v11  ;;  %v625_v13 = vpop.f32.mrb[5].mxu0 }
 0x44a   :  { %v488_v14 = vpop.f32.mrb[6].mxu0 }
 0x44b   :  { %491 = vst [vmem:[#allocation10] sm:$0xff] %v486_v12  ;;  %v626_v15 = vpop.f32.mrb[7].mxu0 }
 0x44c   :  { %763 = shalt.err (!%p760_p8)
}
 0x44d   :  { %s764_s10 = scalar_lea.hbm %s982_s11, 128 }
 0x44e   :  { %p765_p9 = scmp.ne.s32.totalorder %s982_s11, %s764_s10  ;;  %p768_p10 = scmp.lt.u32.totalorder %s764_s10, %s982_s11 }
 0x450   :  { %p770_p11 = pnand %p768_p10, %p765_p9 }
 0x452   :  { %773 = shalt.err (!%p770_p11)
}
 0x453   :  { %501 = dma.vmem_to_hbm [thread:$0]  %s499_s19, 128, %s982_s11, [#allocation4]  }
 0x454   :  { %780 = dma.done.wait [#allocation4], 128  }
 0x455   :  { %781 = vsyncadd [#allocation4], 4294967168 }
 0x456   :  { %505 = vsyncpa [#allocation3], 1 }
 0x457   :  { %506 = vsyncpa [#allocation6], 1 }
 0x458   :  { %507 = vsyncpa [#allocation9], 1 }
 0x459   :  { %508 = vsyncpa [#allocation4], 1 }

</bundles_post_ra>
